<compile_context>
chip_gen: v6e
topology: v6e:2x2x1
jax: 0.10.0
libtpu: 0.0.40
codegen_flags: <defaults>
</compile_context>

<pallas_src>
import functools

import jax
import jax.numpy as jnp
from jax.experimental import pallas as pl
from jax.experimental.pallas import tpu as pltpu


def _round_up(n, m):
    return ((n + m - 1) // m) * m


def _round_down(n, m):
    return (n // m) * m


def _vmem_budget_bytes():
    """Conservative per-call VMEM budget that stays under the default scoped limit."""
    kind = ""
    try:
        kind = jax.devices()[0].device_kind.lower()
    except Exception:
        pass
    if "v6" in kind or "v7" in kind:
        # 32 MiB default scoped (on v7x that is 32-of-64 MiB physical) -- leave headroom.
        return 26 * 1024 * 1024
    # v5e / older / unknown: 16 MiB default scoped.
    return 13 * 1024 * 1024


def _fm_kernel_mxu(x_ref, g_ref, o_ref):
    """x_ref: (TB, F*D) lane-dense block; g_ref: (F*D, D) stacked identities; o_ref: (1, TB)."""
    xf = x_ref[...].astype(jnp.float32)
    # Sum over fields per embedding dim on the MXU (VPU slabs at non-128-aligned lane
    # offsets would lower to masked selects). G is 0/1 so this is an exact gather-sum.
    field_sum = jnp.dot(xf, g_ref[...], preferred_element_type=jnp.float32)      # (TB, D)
    # PyTorch "sum_of_square" = (sum_f x)^2, then reduced over D.
    sq_of_field_sum = jnp.sum(field_sum * field_sum, axis=-1, keepdims=True)     # (TB, 1)
    # PyTorch "square_of_sum" = sum_f x^2, then reduced over D (== reduce over F*D).
    sum_of_field_sq = jnp.sum(xf * xf, axis=-1, keepdims=True)                   # (TB, 1)
    bi = 0.5 * (sq_of_field_sum - sum_of_field_sq)                               # (TB, 1)
    # Lane-dense store: (TB, 1) -> (1, TB); hidden under the DMA time.
    o_ref[...] = bi.T.astype(o_ref.dtype)


def _fm_kernel_vpu(x_ref, o_ref, *, num_fields, embed_dim):
    """VPU slab loop (used when D is lane-aligned, or the identity stack would be large).

    The self-square reduction is fused per D-slab, so no (TB, F*D) f32 temporary is
    materialized -- this buys a larger batch tile under the same VMEM budget.
    """
    D = embed_dim
    slab = x_ref[:, 0:D].astype(jnp.float32)
    field_sum = slab
    sum_of_field_sq = jnp.sum(slab * slab, axis=-1, keepdims=True)               # (TB, 1)
    for f in range(1, num_fields):
        slab = x_ref[:, f * D:(f + 1) * D].astype(jnp.float32)
        field_sum = field_sum + slab
        sum_of_field_sq = sum_of_field_sq + jnp.sum(slab * slab, axis=-1, keepdims=True)
    sq_of_field_sum = jnp.sum(field_sum * field_sum, axis=-1, keepdims=True)     # (TB, 1)
    bi = 0.5 * (sq_of_field_sum - sum_of_field_sq)
    o_ref[...] = bi.T.astype(o_ref.dtype)


def factorization_machine(input_embeddings, *, block_rows=None):
    """FM bi-interaction: (B, F, D) -> (B, 1), f32 output.

    Accepts float32 or bfloat16 embeddings; bf16 halves HBM traffic and is upcast to
    f32 inside the kernel before any arithmetic.
    """
    B, F, D = input_embeddings.shape
    FD = F * D
    x = input_embeddings.reshape(B, FD)                 # free, contiguous; lane dim = F*D
    itemsize = jnp.dtype(x.dtype).itemsize

    # MXU field-sum when D isn't lane-aligned and the identity stack stays small.
    use_mxu = (D % 128 != 0) and (FD * D * 4 <= (2 << 20))

    # ---- batch tile from the generation-aware scoped-VMEM budget -------------------
    fd_pad = _round_up(FD, 128)
    # Per-row VMEM cost: 2x double-buffered input rows + ~3x f32-rows of in-kernel
    # temporaries (f32 upcast, squares / field_sum, headroom).
    per_row = 2 * fd_pad * itemsize + 3 * fd_pad * 4
    budget = _vmem_budget_bytes()
    if use_mxu:
        budget -= 2 * FD * D * 4                         # resident identity stack buffers
    tb = max(128, _round_down(budget // per_row, 128))
    # TODO(synk): if F*D is so large that even a 128-row tile exceeds the scoped VMEM
    # budget, the F*D axis would also need tiling (reduction grid axis); not done here.
    if block_rows is not None:
        tb = max(128, _round_down(min(tb, block_rows), 128))
    if B > 256:
        # Keep >= 2 (roughly balanced) tiles so the "parallel" batch axis shards across
        # the two v7x TensorCores; negligible effect on single-core v5e/v6e.
        tb = min(tb, _round_up(pl.cdiv(B, 2), 128))

    # ---- grid / block specs (no padding; tail tile handled by the cdiv grid) -------
    if tb >= B:
        grid = (1,)
        x_spec = pl.BlockSpec((B, FD), lambda i: (0, 0))
        out_spec = pl.BlockSpec((1, B), lambda i: (0, 0))
    else:
        grid = (pl.cdiv(B, tb),)
        x_spec = pl.BlockSpec((tb, FD), lambda i: (i, 0))
        out_spec = pl.BlockSpec((1, tb), lambda i: (0, i))

    if use_mxu:
        g = jnp.tile(jnp.eye(D, dtype=jnp.float32), (F, 1))        # (F*D, D), ~F*D*D*4 bytes
        g_spec = pl.BlockSpec((FD, D), lambda i: (0, 0))           # resident constant block
        kernel = _fm_kernel_mxu
        in_specs = [x_spec, g_spec]
        args = (x, g)
        g_bytes = FD * D * 4
    else:
        kernel = functools.partial(_fm_kernel_vpu, num_fields=F, embed_dim=D)
        in_specs = [x_spec]
        args = (x,)
        g_bytes = 0

    cost = pl.CostEstimate(
        flops=2 * B * FD * (D if use_mxu else 1) + 4 * B * FD,
        transcendentals=0,
        bytes_accessed=B * FD * itemsize + 4 * B + g_bytes,
    )

    out = pl.pallas_call(
        kernel,
        out_shape=jax.ShapeDtypeStruct((1, B), jnp.float32),
        grid_spec=pltpu.PrefetchScalarGridSpec(
            num_scalar_prefetch=0,
            grid=grid,
            in_specs=in_specs,
            out_specs=out_spec,
        ),
        compiler_params=pltpu.CompilerParams(
            dimension_semantics=("parallel",),
        ),
        cost_estimate=cost,
    )(*args)

    # (1, B) -> (B, 1): same contiguous data order, free reshape.
    return out.reshape(B, 1)


def factorization_machine_ref(x):
    """Pure-JAX reference mirroring the PyTorch forward (f32)."""
    x = x.astype(jnp.float32)
    sum_of_square = jnp.sum(x, axis=1) ** 2
    square_of_sum = jnp.sum(x ** 2, axis=1)
    bi = (sum_of_square - square_of_sum) * 0.5
    return jnp.sum(bi, axis=-1, keepdims=True)


if __name__ == "__main__":
    key = jax.random.PRNGKey(0)
    k1, k2, k3 = jax.random.split(key, 3)

    # 1) Small single-tile path, MXU field-sum (D = 32 is not lane-aligned).
    B, F, D = 8, 4, 32
    x = jax.random.normal(k1, (B, F, D), dtype=jnp.float32)
    out = jax.block_until_ready(factorization_machine(x))
    ref = factorization_machine_ref(x)
    assert out.shape == (B, 1)
    assert jnp.allclose(out, ref, atol=2e-3, rtol=2e-3)

    # 2) Multi-tile path with a ragged tail tile (no jnp.pad) and >= 2 tiles.
    B2 = 300
    x2 = jax.random.normal(k2, (B2, F, D), dtype=jnp.float32)
    out2 = jax.block_until_ready(factorization_machine(x2))
    ref2 = factorization_machine_ref(x2)
    assert out2.shape == (B2, 1)
    assert jnp.allclose(out2, ref2, atol=2e-3, rtol=2e-3)

    # 3) bf16 inputs: half the HBM bytes streamed; f32 accumulation inside the kernel.
    x2_bf16 = x2.astype(jnp.bfloat16)
    out3 = jax.block_until_ready(factorization_machine(x2_bf16))
    ref3 = factorization_machine_ref(x2_bf16)
    assert jnp.allclose(out3, ref3, atol=2e-2, rtol=2e-2)

    # 4) Lane-aligned embedding dim exercises the fused VPU slab-loop variant.
    B4, F4, D4 = 16, 3, 128
    x4 = jax.random.normal(k3, (B4, F4, D4), dtype=jnp.float32)
    out4 = jax.block_until_ready(factorization_machine(x4))
    ref4 = factorization_machine_ref(x4)
    assert out4.shape == (B4, 1)
    assert jnp.allclose(out4, ref4, atol=2e-3, rtol=2e-3)

    print("KERNEL_OK")
</pallas_src>

<mosaic_0001>
module attributes {stable_mosaic.version = 11 : i64} {
  func.func @_fm_kernel_mxu(%arg0: i32, %arg1: memref<8x128xf32, #tpu.memory_space<vmem>>, %arg2: memref<128x32xf32, #tpu.memory_space<vmem>>, %arg3: memref<1x8xf32, #tpu.memory_space<vmem>>) attributes {dimension_semantics = [#tpu.dimension_semantics<parallel>], iteration_bounds = array<i64: 1>, scalar_prefetch = 0 : i64, scratch_operands = 0 : i64, tpu.core_type = #tpu.core_type<tc>, window_params = [{pipeline_mode = #tpu.pipeline_mode<synchronous>, transform_indices = @transform_0, window_bounds = array<i64: 8, 128>}, {pipeline_mode = #tpu.pipeline_mode<synchronous>, transform_indices = @transform_1, window_bounds = array<i64: 128, 32>}, {pipeline_mode = #tpu.pipeline_mode<synchronous>, transform_indices = @transform_2, window_bounds = array<i64: 1, 8>}]} {
    %c0 = arith.constant 0 : index
    %c0_0 = arith.constant 0 : index
    %0 = vector.load %arg1[%c0, %c0_0] : memref<8x128xf32, #tpu.memory_space<vmem>>, vector<8x128xf32>
    %c0_1 = arith.constant 0 : index
    %c0_2 = arith.constant 0 : index
    %1 = vector.load %arg2[%c0_1, %c0_2] : memref<128x32xf32, #tpu.memory_space<vmem>>, vector<128x32xf32>
    %cst = arith.constant dense<0.000000e+00> : vector<8x32xf32>
    %2 = tpu.matmul %0, %1, %cst {dimension_numbers = #tpu.dot_dimension_numbers<[1], [0], [0], [1], [0, 0, 1, 1], [], []>} : vector<8x128xf32>, vector<128x32xf32>, vector<8x32xf32> -> vector<8x32xf32>
    %3 = arith.mulf %2, %2 : vector<8x32xf32>
    %cst_3 = arith.constant dense<0.000000e+00> : vector<8xf32>
    %4 = vector.multi_reduction <add>, %3, %cst_3 [1] : vector<8x32xf32> to vector<8xf32>
    %5 = vector.shape_cast %4 : vector<8xf32> to vector<8x1xf32>
    %6 = arith.mulf %0, %0 : vector<8x128xf32>
    %cst_4 = arith.constant dense<0.000000e+00> : vector<8xf32>
    %7 = vector.multi_reduction <add>, %6, %cst_4 [1] : vector<8x128xf32> to vector<8xf32>
    %8 = vector.shape_cast %7 : vector<8xf32> to vector<8x1xf32>
    %9 = arith.subf %5, %8 : vector<8x1xf32>
    %cst_5 = arith.constant 5.000000e-01 : f32
    %10 = vector.broadcast %cst_5 : f32 to vector<8x1xf32>
    %11 = arith.mulf %10, %9 : vector<8x1xf32>
    %12 = tpu.transpose %11, [1, 0] : vector<8x1xf32> -> vector<1x8xf32>
    %c0_6 = arith.constant 0 : index
    %c0_7 = arith.constant 0 : index
    %13 = vector.load %arg3[%c0_6, %c0_7] : memref<1x8xf32, #tpu.memory_space<vmem>>, vector<1x8xf32>
    tpu.vector_store %arg3[%c0_6, %c0_7], %12 {strides = array<i32>} : memref<1x8xf32, #tpu.memory_space<vmem>>, vector<1x8xf32>,
    return
  }
  func.func @transform_0(%arg0: i32) -> (i32, i32) {
    %c0_i32 = arith.constant 0 : i32
    %c0_i32_0 = arith.constant 0 : i32
    %c0_i32_1 = arith.constant 0 : i32
    return %c0_i32, %c0_i32_0 : i32, i32
  }
  func.func @transform_1(%arg0: i32) -> (i32, i32) {
    %c0_i32 = arith.constant 0 : i32
    %c0_i32_0 = arith.constant 0 : i32
    %c0_i32_1 = arith.constant 0 : i32
    return %c0_i32, %c0_i32_0 : i32, i32
  }
  func.func @transform_2(%arg0: i32) -> (i32, i32) {
    %c0_i32 = arith.constant 0 : i32
    %c0_i32_0 = arith.constant 0 : i32
    %c0_i32_1 = arith.constant 0 : i32
    return %c0_i32, %c0_i32_0 : i32, i32
  }
}

</mosaic_0001>

<bundles_post_ra>
// kernel: tpu_custom_call.1
= control target key start
LH: loop header
LB: loop body
LE: loop exit
PB: predicated region body
PF: predicated region fallthrough
CT: control target
= control target key end

     0   :  { %v234_v1 = vmov 0.0   ;;  %vm235_vm0 = vmmov 0   ;;  %s306_s0 = inlined_call_operand.vmem [shape: f32[8,128], index: 0, kind: input, shape index: {}]   ;;  %s307_s1 = inlined_call_operand.vmem [shape: f32[128,32], index: 1, kind: input, shape index: {}]   ;;  %s308_s2 = inlined_call_operand.hbm [shape: f32[1,8], index: 2, kind: output, shape index: {}]  }
   0x1   :  { %v28_v0 = vld [vmem:[%s307_s1 + $0x78] sm:$0xff]  ;;  %174 = vmatprep.subr.mxu0 %v234_v1  ;;  %v27_v2 = vld [vmem:[%s307_s1 + $0x70] sm:$0xff]  ;;  %206 = vmatprep.mubr.msk.f32.mxu0 %vm235_vm0, %v234_v1  ;;  %v26_v3 = vld [vmem:[%s307_s1 + $0x68] sm:$0xff] }
   0x2   :  { %175 = vmatpush3.msra.mxu0 %v28_v0  ;;  %v25_v4 = vld [vmem:[%s307_s1 + $0x60] sm:$0xff] }
   0x3   :  { %176 = vmatprep.subr.mxu0 %v234_v1 }
   0x4   :  { %177 = vmatpush3.msra.mxu0 %v27_v2 }
   0x5   :  { %178 = vmatprep.subr.mxu0 %v234_v1 }
   0x6   :  { %7 = vsyncpa [#allocation3], 0  ;;  %179 = vmatpush3.msra.mxu0 %v26_v3  ;;  %v24_v5 = vld [vmem:[%s307_s1 + $0x58] sm:$0xff]  ;;  %v23_v6 = vld [vmem:[%s307_s1 + $0x50] sm:$0xff]  ;;  %vm100_vm1 = vcmask 261120   ;;  %vm141_vm2 = vcmask 57344  }
   0x7   :  { %180 = vmatprep.subr.mxu0 %v234_v1  ;;  %v22_v7 = vld [vmem:[%s307_s1 + $0x48] sm:$0xff]  ;;  %v21_v8 = vld [vmem:[%s307_s1 + $0x40] sm:$0xff]  ;;  %v20_v9 = vld [vmem:[%s307_s1 + $0x38] sm:$0xff] }
   0x8   :  { %181 = vmatpush3.msra.mxu0 %v25_v4  ;;  %v19_v10 = vld [vmem:[%s307_s1 + $0x30] sm:$0xff]  ;;  %v18_v11 = vld [vmem:[%s307_s1 + $0x28] sm:$0xff]  ;;  %v17_v12 = vld [vmem:[%s307_s1 + $0x20] sm:$0xff] }
   0x9   :  { %182 = vmatprep.subr.mxu0 %v234_v1  ;;  %v16_v13 = vld [vmem:[%s307_s1 + $0x18] sm:$0xff]  ;;  %v15_v14 = vld [vmem:[%s307_s1 + $0x10] sm:$0xff]  ;;  %v14_v15 = vld [vmem:[%s307_s1 + $0x8] sm:$0xff] }
   0xa   :  { %183 = vmatpush3.msra.mxu0 %v24_v5  ;;  %v13_v16 = vld [vmem:[%s307_s1] sm:$0xff]  ;;  %s236_s1 = smov [#allocation2]  }
   0xb   :  { %184 = vmatprep.subr.mxu0 %v234_v1  ;;  %v12_v17 = vld [vmem:[%s306_s0] sm:$0xff]  ;;  %s149_s15 = sshll.u32 %s236_s1, 4  ;;  %s150_s15 = int_to_ptr.vmem [resolvable:$true] %s149_s15 }
   0xc   :  { %185 = vmatpush3.msra.mxu0 %v23_v6  ;;  %v104_v22 = vmul.f32 %v12_v17, %v12_v17  ;;  %s212_s0 = scalar_lea.vmem %s150_s15, 16  ;;  %s216_s16 = scalar_lea.vmem %s150_s15, 32 }
   0xd   :  { %186 = vmatprep.subr.mxu0 %v234_v1  ;;  %p213_p0 = scmp.ne.s32.totalorder %s150_s15, %s212_s0  ;;  %p217_p1 = scmp.lt.s32.totalorder %s150_s15, %s150_s15 }
   0xe   :  { %187 = vmatpush3.msra.mxu0 %v22_v7  ;;  %p218_p2 = scmp.lt.s32.totalorder %s216_s16, %s212_s0 }
   0xf   :  { %188 = vmatprep.subr.mxu0 %v234_v1 }
  0x10   :  { %189 = vmatpush3.msra.mxu0 %v21_v8  ;;  %p219_p3 = por %p218_p2, %p217_p1 }
  0x11   :  { %190 = vmatprep.subr.mxu0 %v234_v1 }
  0x12   :  { %191 = vmatpush3.msra.mxu0 %v20_v9  ;;  %p220_p4 = pnand %p219_p3, %p213_p0 }
  0x13   :  { %192 = vmatprep.subr.mxu0 %v234_v1 }
  0x14   :  { %193 = vmatpush3.msra.mxu0 %v19_v10 }
  0x15   :  { %194 = vmatprep.subr.mxu0 %v234_v1 }
  0x16   :  { %195 = vmatpush3.msra.mxu0 %v18_v11 }
  0x17   :  { %196 = vmatprep.subr.mxu0 %v234_v1 }
  0x18   :  { %197 = vmatpush3.msra.mxu0 %v17_v12 }
  0x19   :  { %198 = vmatprep.subr.mxu0 %v234_v1 }
  0x1a   :  { %199 = vmatpush3.msra.mxu0 %v16_v13 }
  0x1b   :  { %200 = vmatprep.subr.mxu0 %v234_v1 }
  0x1c   :  { %201 = vmatpush3.msra.mxu0 %v15_v14 }
  0x1d   :  { %202 = vmatprep.subr.mxu0 %v234_v1 }
  0x1e   :  { %203 = vmatpush3.msra.mxu0 %v14_v15 }
  0x1f   :  { %204 = vmatprep.subr.mxu0 %v234_v1 }
  0x20   :  { %205 = vmatpush3.msra.mxu0 %v13_v16 }
  0x21   :  { %207 = vmatmul.mubr.f32.vlgmr.msra.gmra.mxu0 %v12_v17 }
  0xe1   :  { %v95_v18 = vpop.f32.mrf.mxu0 }
  0xe2   :  { %v99_v19 = vmul.f32 %v95_v18, %v95_v18 }
  0xe3   :  { %v208_v20 = vpop.f32.mrf.mxu0 }
  0xe4   :  { %v101_v21 = vsel %vm100_vm1, %v99_v19, 0.0 }
  0xe5   :  { %102 = vadd.xlane.f32.xlu0 %v101_v21 }
  0xe9   :  { %105 = vadd.xlane.f32.xlu0 %v104_v22 }
 0x16e   :  { %v103_v23 = vpop.xlane.xlu0 %102 }
 0x172   :  { %v106_v24 = vpop.xlane.xlu0 %105 }
 0x173   :  { %v107_v25 = vsub.f32 %v103_v23, %v106_v24 }
 0x175   :  { %v108_v26 = vmul.f32 0.5, %v107_v25 }
 0x177   :  { %109 = vxpose.xlu1.b32.start.end [1/1] (short) (narrow) %v108_v26, 8 }
 0x1f3   :  { %v125_v27 = vpop.trf.xlu1 }
 0x1f4   :  { %142 = vst.msk [vmem:[#allocation2] sm:$0x1] %vm141_vm2, %v125_v27 }
 0x1f5   :  { %223 = shalt.err (!%p220_p4)
}
 0x1f6   :  { %152 = dma.vmem_to_hbm [thread:$0]  %s150_s15, 16, %s308_s2, [#allocation3]  }
 0x1f7   :  { %232 = dma.done.wait [#allocation3], 16  }
 0x1f8   :  { %233 = vsyncadd [#allocation3], 4294967280 }
 0x1f9   :  { %156 = vsyncpa [#allocation3], 1 }

</bundles_post_ra>
